<compile_context>
chip_gen: v7x
topology: tpu7x:2x2x1
jax: 0.10.0
libtpu: 0.0.40
codegen_flags: <defaults>
</compile_context>

<pallas_src>
import functools

import jax
import jax.numpy as jnp
from jax import lax
from jax.experimental import pallas as pl
from jax.experimental.pallas import tpu as pltpu

NEG = -1.0e30     # effective -inf for log-space DP (frozen lanes leak ~log(3)/step; keep -1e30)


@functools.lru_cache(maxsize=None)
def _vmem_limit_bytes():
    """Generation-aware scoped-VMEM request: ~3/4 of physical VMEM, clamped to [32, 100] MiB."""
    cap = 64 * 1024 * 1024                                   # conservative (v7x-sized) fallback
    try:
        cap = int(getattr(pltpu.get_tpu_info(), "vmem_capacity_bytes", cap)) or cap
    except Exception:
        pass
    return int(min(100 * 1024 * 1024, max(32 * 1024 * 1024, (cap * 3) // 4)))


def _choose_step_tile(total, bytes_per_step, budget, cap=512):
    """Largest multiple-of-8 tile along a pipelined axis that fits `budget`, or the full extent."""
    if total <= 8 or total * bytes_per_step <= budget:
        return total
    t = min(cap, int(budget // max(bytes_per_step, 1)))
    t = max(8, (t // 8) * 8)
    return min(t, total)


# --------------------------------------------------------------------------
# 1) CTC recognition loss (nn.CTCLoss(blank=blank_index, zero_infinity=True))
# --------------------------------------------------------------------------
def _ctc_gather_kernel(lp_ref, oh_ref, g_ref):
    # lp_ref: (B, tT, C) log-probs tile (caller dtype); oh_ref: (B, C, Lp) one-hot of the
    # blank-interleaved labels (same dtype; contraction dim C second-to-last, lanes = Lp).
    # g_ref: (tT, B, Lp) f32 -- already time-major for stage 2, so no HBM transpose.
    #   g[t, b, l] = lp[b, t, ext_label[b, l]]   (exact one-hot selection, f32 accumulate)
    B = lp_ref.shape[0]
    for b in range(B):                         # static unroll over the (small) batch
        g_ref[:, b, :] = jnp.dot(lp_ref[b], oh_ref[b],
                                 preferred_element_type=jnp.float32)


def _ctc_dp_kernel(g_ref, allow2_ref, flen_ref, glen_ref, out_ref, alpha_sc):
    # Serial CTC alpha recursion over one time tile; alpha carried across tiles in scratch.
    i = pl.program_id(0)
    tT, B, Lp = g_ref.shape
    pos = lax.broadcasted_iota(jnp.int32, (B, Lp), 1)
    flen = flen_ref[...]                                     # (B, 1) input lengths
    glen = glen_ref[...]                                     # (B, 1) target lengths
    neg = jnp.full((B, Lp), NEG, jnp.float32)
    # loop-invariant masks hoisted off the serial critical path
    mask1 = pos >= 1
    mask2 = (pos >= 2) & (allow2_ref[...] != 0)

    @pl.when(i == 0)
    def _():
        lp0 = g_ref[0]
        a0 = jnp.where((pos == 0) | ((pos == 1) & (glen >= 1)), lp0, NEG)
        alpha_sc[...] = jnp.where(flen > 0, a0, neg)         # frames_len == 0 -> stays -inf

    t0 = i * tT

    def body(tl, alpha):
        lp_t = g_ref[tl]                                     # dynamic leading-dim load (B, Lp)
        a1 = jnp.where(mask1, pltpu.roll(alpha, shift=1, axis=1), neg)
        a2 = jnp.where(mask2, pltpu.roll(alpha, shift=2, axis=1), neg)
        # exact max / median / min via min-max (cancellation-safe) -> 2 exps + 1 log per step
        p = jnp.maximum(alpha, a1)
        q = jnp.minimum(alpha, a1)
        mx = jnp.maximum(p, a2)
        mn = jnp.minimum(q, a2)
        md = jnp.maximum(q, jnp.minimum(p, a2))
        lse = mx + jnp.log(1.0 + jnp.exp(mn - mx) + jnp.exp(md - mx))
        t = t0 + tl
        upd = (t >= 1) & (t < flen)          # skip global t=0 (the init) & freeze finished samples
        return jnp.where(upd, lp_t + lse, alpha)

    alpha_sc[...] = lax.fori_loop(0, tT, body, alpha_sc[...], unroll=4)

    @pl.when(i == pl.num_programs(0) - 1)
    def _():
        alpha = alpha_sc[...]
        last = 2 * glen
        a_last = jnp.max(jnp.where(pos == last, alpha, neg), axis=1, keepdims=True)
        a_prev = jnp.max(jnp.where(pos == last - 1, alpha, neg), axis=1, keepdims=True)
        m = jnp.maximum(a_last, a_prev)
        ll = jnp.where(m > 0.5 * NEG,
                       m + jnp.log(jnp.exp(a_last - m) + jnp.exp(a_prev - m)),
                       NEG)
        loss_b = jnp.where(ll > 0.5 * NEG, -ll, 0.0)         # zero_infinity=True
        norm = jnp.maximum(glen, 1).astype(jnp.float32)      # reduction='mean'
        out_ref[...] = jnp.sum(loss_b / norm, axis=0, keepdims=True) / B


def ctc_loss_pallas(glosses_probs, glosses, frames_len, glosses_len, blank_index):
    B, T, C = glosses_probs.shape
    S = glosses.shape[1]
    L = 2 * S + 1
    Lp = ((L + 127) // 128) * 128          # extended-label axis padded to full 128-lane vregs
    dt = glosses_probs.dtype
    itemsize = jnp.dtype(dt).itemsize
    limit = _vmem_limit_bytes()

    # blank-interleaved extended targets + skip-connection mask on the padded axis.
    s_idx = jnp.arange(Lp)
    # TODO(synk): S == 0 (empty gloss target tensor) is not handled, as in the original port.
    lab = glosses[:, jnp.clip(s_idx // 2, 0, max(S - 1, 0))].astype(jnp.int32)
    ext = jnp.where((s_idx % 2) == 1, lab, blank_index).astype(jnp.int32)        # (B, Lp)
    ext_m2 = jnp.concatenate([jnp.full((B, 2), -1, jnp.int32), ext[:, :-2]], axis=1)
    allow2 = ((ext != blank_index) & (ext != ext_m2)
              & (s_idx[None, :] >= 2)).astype(jnp.int32)                         # (B, Lp)
    # one-hot laid out (B, C, Lp): contraction dim second-to-last, lane axis already padded.
    onehot = (ext[:, None, :] == jnp.arange(C, dtype=jnp.int32)[None, :, None]).astype(dt)

    flen = frames_len.reshape(B, 1).astype(jnp.int32)
    glen = glosses_len.reshape(B, 1).astype(jnp.int32)

    # ---- stage 1: pipelined MXU gather, emitting (T, B, Lp) directly ----
    budget = limit // 2
    resident = B * C * Lp * itemsize                   # one-hot stays resident in VMEM
    per_t = 2 * B * C * itemsize + 2 * B * Lp * 4      # double-buffered lp rows + f32 out rows
    tT = _choose_step_tile(T, per_t, max(budget - resident, 8 * per_t), cap=512)
    g_tbl = pl.pallas_call(
        _ctc_gather_kernel,
        out_shape=jax.ShapeDtypeStruct((T, B, Lp), jnp.float32),
        grid=(pl.cdiv(T, tT),),
        in_specs=[pl.BlockSpec((B, tT, C), lambda i: (0, i, 0)),
                  pl.BlockSpec((B, C, Lp), lambda i: (0, 0, 0))],
        out_specs=pl.BlockSpec((tT, B, Lp), lambda i: (i, 0, 0)),
        compiler_params=pltpu.CompilerParams(
            dimension_semantics=("parallel",),
            vmem_limit_bytes=limit),
    )(glosses_probs, onehot)

    # ---- stage 2: serial alpha DP, pipelined over time tiles, alpha in VMEM scratch ----
    per_t_dp = 2 * B * Lp * 4
    tTd = _choose_step_tile(T, per_t_dp, budget, cap=1024)
    out = pl.pallas_call(
        _ctc_dp_kernel,
        out_shape=jax.ShapeDtypeStruct((1, 1), jnp.float32),
        grid=(pl.cdiv(T, tTd),),
        in_specs=[pl.BlockSpec((tTd, B, Lp), lambda i: (i, 0, 0)),
                  pl.BlockSpec((B, Lp), lambda i: (0, 0)),
                  pl.BlockSpec((B, 1), lambda i: (0, 0)),
                  pl.BlockSpec((B, 1), lambda i: (0, 0))],
        out_specs=pl.BlockSpec((1, 1), lambda i: (0, 0)),
        scratch_shapes=[pltpu.VMEM((B, Lp), jnp.float32)],
        compiler_params=pltpu.CompilerParams(
            dimension_semantics=("arbitrary",),
            vmem_limit_bytes=limit),
    )(g_tbl, allow2, flen, glen)
    return out[0, 0]


# --------------------------------------------------------------------------
# 2) NLL translation loss (nn.NLLLoss(reduction='sum', ignore_index)) / batch
# --------------------------------------------------------------------------
def _nll_kernel(tgt_ref, wo_ref, out_ref, *, ignore_index, seq_len):
    jv = pl.program_id(1)
    jl = pl.program_id(2)

    @pl.when((jv == 0) & (jl == 0))
    def _():
        out_ref[...] = jnp.zeros_like(out_ref)

    _, tLw, tV = wo_ref.shape
    wo = wo_ref[...]                                        # native dtype -- no f32 tile copy
    tgt = tgt_ref[...]                                      # (1, tLw, 1) int32
    v_iota = jv * tV + lax.broadcasted_iota(jnp.int32, (1, 1, tV), 2)
    pick = tgt == v_iota                                    # (1, tLw, tV)
    # one-hot select + V-reduction in native dtype (exactly one nonzero per row -> exact)
    row = jnp.sum(jnp.where(pick, wo, jnp.array(0, wo.dtype)), axis=2)      # (1, tLw)
    l_pos = jl * tLw + lax.broadcasted_iota(jnp.int32, (1, tLw), 1)
    valid = (l_pos < seq_len) & (tgt[:, :, 0] != ignore_index)              # row-level mask
    masked = jnp.where(valid, row.astype(jnp.float32), 0.0)
    out_ref[0] += jnp.sum(masked, axis=1, keepdims=True)                    # (1, 1) partial


def _nll_tiles(Lw, V, itemsize, budget):
    """Pick (tLw, tV) so one double-buffered (1, tLw, tV) block fits within `budget`."""
    if 2 * Lw * V * itemsize <= budget:
        return Lw, V
    tLw = (int(budget // (2 * V * itemsize)) // 8) * 8
    if tLw >= 8:
        return min(tLw, 1024, Lw), V
    if V <= 128:
        return 8, V
    tV = max(128, (int(budget // (2 * 8 * itemsize)) // 128) * 128)
    return 8, min(tV, V)


def nll_loss_pallas(words_output, words, ignore_index):
    B, Lw, V = words_output.shape
    itemsize = jnp.dtype(words_output.dtype).itemsize
    limit = _vmem_limit_bytes()
    # target for position l is words[l+1]; the dropped last logit column is expressed by
    # padding the shifted targets with ignore_index (no slicing of the big logits tensor).
    tgt = jnp.concatenate([words[:, 1:].astype(jnp.int32),
                           jnp.full((B, 1), int(ignore_index), jnp.int32)], axis=1)
    tgt3 = tgt[:, :, None]                                   # (B, Lw, 1)

    tLw, tV = _nll_tiles(Lw, V, itemsize, limit // 2)
    grid = (B, pl.cdiv(V, tV), pl.cdiv(Lw, tLw))             # B axis is parallel (megacore/2-TC)
    part = pl.pallas_call(
        functools.partial(_nll_kernel, ignore_index=int(ignore_index), seq_len=Lw - 1),
        out_shape=jax.ShapeDtypeStruct((B, 1, 1), jnp.float32),
        grid=grid,
        in_specs=[pl.BlockSpec((1, tLw, 1), lambda b, jv, jl: (b, jl, 0)),
                  pl.BlockSpec((1, tLw, tV), lambda b, jv, jl: (b, jl, jv))],
        out_specs=pl.BlockSpec((1, 1, 1), lambda b, jv, jl: (b, 0, 0)),
        compiler_params=pltpu.CompilerParams(
            dimension_semantics=("parallel", "arbitrary", "arbitrary"),
            vmem_limit_bytes=limit),
    )(tgt3, words_output)
    return -jnp.sum(part) / B                                # NLL sum, then /= batch


# --------------------------------------------------------------------------
# 3) EmotionLossMasking (masked KLDivLoss(reduction='sum'))
# --------------------------------------------------------------------------
def _emotion_kernel(flen_ref, tgt_ref, outp_ref, out_ref, tot_sc, cap_sc, *, epsilon):
    j = pl.program_id(0)

    @pl.when(j == 0)
    def _():
        tot_sc[...] = jnp.zeros_like(tot_sc)
        cap_sc[...] = jnp.zeros_like(cap_sc)

    B, F, tT = tgt_ref.shape                                # F=7 on sublanes, T tile on lanes
    tgt = tgt_ref[...].astype(jnp.float32)
    outp = outp_ref[...].astype(jnp.float32)
    flen = flen_ref[...]                                    # (B, 1)
    t_pos = j * tT + lax.broadcasted_iota(jnp.int32, (B, tT), 1)
    valid = t_pos < flen                                    # (B, tT)

    # "captured" frames = frames whose target row is not the uniform 1/F distribution
    # (torch.round(target, decimals=4) == round(1/F, 4) on all F entries).
    rounded = jnp.round(tgt * 10000.0) / 10000.0
    uniform_val = jnp.float32(round(1.0 / F, 4))
    is_unif = (jnp.abs(rounded - uniform_val) < 1e-6).astype(jnp.int32)
    capture = valid & (jnp.sum(is_unif, axis=1) != F)       # (B, tT)

    kl_elem = jnp.where(tgt > 0.0, tgt * (jnp.log(tgt) - outp), 0.0)
    kl_row = jnp.sum(kl_elem, axis=1)                       # (B, tT)
    masked = jnp.where(capture, kl_row, 0.0)

    tot_sc[...] += jnp.sum(masked, axis=(0, 1), keepdims=True)
    cap_sc[...] = jnp.maximum(cap_sc[...],
                              jnp.max(capture.astype(jnp.float32), axis=1, keepdims=True))

    @pl.when(j == pl.num_programs(0) - 1)
    def _():
        counter = jnp.sum(cap_sc[...], axis=0, keepdims=True)               # (1, 1)
        # TODO(synk): counter == 0 raises ZeroDivisionError in PyTorch; here it yields inf.
        out_ref[...] = (tot_sc[...] + epsilon) / counter


def emotion_loss_pallas(emo, emo_output, frames_len, epsilon=1e-05):
    B, T, F = emo.shape
    itemsize = jnp.dtype(emo.dtype).itemsize
    limit = _vmem_limit_bytes()
    flen = frames_len.reshape(B, 1).astype(jnp.int32)
    # relayout (B, T, F=7) -> (B, F, T): reduction dim on sublanes, lane-dense T axis.
    emo_t = jnp.transpose(emo, (0, 2, 1))
    emo_out_t = jnp.transpose(emo_output, (0, 2, 1))

    per_t = 2 * 2 * B * F * itemsize                        # two inputs, double-buffered
    budget = limit // 4
    if T <= 128 or T * per_t <= budget:
        tT = T
    else:
        tT = min(T, max(128, (int(budget // per_t) // 128) * 128), 2048)
    out = pl.pallas_call(
        functools.partial(_emotion_kernel, epsilon=float(epsilon)),
        out_shape=jax.ShapeDtypeStruct((1, 1), jnp.float32),
        grid=(pl.cdiv(T, tT),),
        in_specs=[pl.BlockSpec((B, 1), lambda j: (0, 0)),
                  pl.BlockSpec((B, F, tT), lambda j: (0, 0, j)),
                  pl.BlockSpec((B, F, tT), lambda j: (0, 0, j))],
        out_specs=pl.BlockSpec((1, 1), lambda j: (0, 0)),
        scratch_shapes=[pltpu.VMEM((1, 1), jnp.float32),
                        pltpu.VMEM((B, 1), jnp.float32)],
        compiler_params=pltpu.CompilerParams(
            dimension_semantics=("arbitrary",),
            vmem_limit_bytes=limit),
    )(flen, emo_t, emo_out_t)
    return out[0, 0]


# --------------------------------------------------------------------------
# FeatureModelLoss (poses_flag=False)
# --------------------------------------------------------------------------
class FeatureModelLossPallas:
    """Pallas port of FeatureModelLoss. Non-learned 'parameters' (blank index,
    ignore index, loss weights, train counters) are set deterministically."""

    def __init__(self, gloss_blank_index, word_ignore_index,
                 gloss_loss_weight=1.0, word_loss_weight=1.0, feature_loss_weight=0.0,
                 feature_train=0, gloss_train=0, decoder_train=0):
        self.gloss_blank_index = int(gloss_blank_index)
        self.word_ignore_index = int(word_ignore_index)
        self.gloss_loss_weight = gloss_loss_weight
        self.word_loss_weight = word_loss_weight
        self.feature_loss_weight = feature_loss_weight
        self.feature_train = feature_train
        self.gloss_train = gloss_train
        self.decoder_train = decoder_train

    def __call__(self, glosses, words, glosses_probs, words_output,
                 frames_len, glosses_len, emo, emo_output):
        recognition_loss = ctc_loss_pallas(glosses_probs, glosses, frames_len,
                                           glosses_len, self.gloss_blank_index)
        translation_loss = nll_loss_pallas(words_output, words, self.word_ignore_index)
        feature_loss = emotion_loss_pallas(emo, emo_output, frames_len)
        if self.feature_train > 0:
            self.feature_train -= 1
            return (self.feature_loss_weight * feature_loss, 0, 0, feature_loss)
        if self.gloss_train > 0:
            self.gloss_train -= 1
            return (self.gloss_loss_weight * recognition_loss, recognition_loss, 0, 0)
        if self.decoder_train > 0:
            self.decoder_train -= 1
            return (self.word_loss_weight * translation_loss, 0, translation_loss, 0)
        total = (self.gloss_loss_weight * recognition_loss
                 + self.word_loss_weight * translation_loss
                 + self.feature_loss_weight * feature_loss)
        return (total, recognition_loss, translation_loss, feature_loss)


if __name__ == "__main__":
    key = jax.random.PRNGKey(0)
    B, T, C, S, Lw, V, F = 2, 12, 16, 4, 8, 32, 7
    ks = jax.random.split(key, 6)

    # CTC side: log-probabilities over gloss vocab, targets, lengths
    glosses_probs = jax.nn.log_softmax(jax.random.normal(ks[0], (B, T, C)), axis=-1)
    glosses = jax.random.randint(ks[1], (B, S), 1, C)        # avoid blank (=0)
    glosses_len = jnp.array([4, 3], dtype=jnp.int32)
    frames_len = jnp.array([12, 10], dtype=jnp.int32)

    # translation side: log-probabilities over word vocab, word ids with padding
    word_ignore_index = 1
    words_output = jax.nn.log_softmax(jax.random.normal(ks[2], (B, Lw, V)), axis=-1)
    words = jax.random.randint(ks[3], (B, Lw), 2, V)
    words = words.at[1, 6:].set(word_ignore_index)

    # emotion side: probability targets (some rows exactly uniform 1/7 -> masked out),
    # log-prob predictions
    emo = jax.nn.softmax(jax.random.normal(ks[4], (B, T, F)), axis=-1)
    emo = emo.at[0, 5:].set(jnp.float32(1.0) / jnp.float32(7.0))
    emo = emo.at[1, 3:7].set(jnp.float32(1.0) / jnp.float32(7.0))
    emo_output = jax.nn.log_softmax(jax.random.normal(ks[5], (B, T, F)), axis=-1)

    loss_fn = FeatureModelLossPallas(
        gloss_blank_index=0,            # gloss_vocab[SIL_TOKEN]
        word_ignore_index=word_ignore_index,
        gloss_loss_weight=1.0, word_loss_weight=1.0, feature_loss_weight=1.0,
        feature_train=0, gloss_train=0, decoder_train=0,
    )

    total, rec, trans, feat = loss_fn(glosses, words, glosses_probs, words_output,
                                      frames_len, glosses_len, emo, emo_output)
    jax.block_until_ready((total, rec, trans, feat))

    for name, v in [("total", total), ("recognition", rec),
                    ("translation", trans), ("feature", feat)]:
        assert bool(jnp.isfinite(v)), f"non-finite {name} loss"

    print("KERNEL_OK")
</pallas_src>

<mosaic_0001>
module attributes {stable_mosaic.version = 11 : i64} {
  func.func @_ctc_gather_kernel(%arg0: i32, %arg1: memref<2x12x16xf32, #tpu.memory_space<vmem>>, %arg2: memref<2x16x128xf32, #tpu.memory_space<vmem>>, %arg3: memref<12x2x128xf32, #tpu.memory_space<vmem>>) attributes {dimension_semantics = [#tpu.dimension_semantics<parallel>], iteration_bounds = array<i64: 1>, scalar_prefetch = 0 : i64, scratch_operands = 0 : i64, tpu.core_type = #tpu.core_type<tc>, window_params = [{transform_indices = @transform_0, window_bounds = array<i64: 2, 12, 16>}, {pipeline_mode = #tpu.pipeline_mode<synchronous>, transform_indices = @transform_1, window_bounds = array<i64: 2, 16, 128>}, {transform_indices = @transform_2, window_bounds = array<i64: 12, 2, 128>}]} {
    %c0 = arith.constant 0 : index
    %c0_0 = arith.constant 0 : index
    %c0_1 = arith.constant 0 : index
    %0 = vector.load %arg1[%c0, %c0_0, %c0_1] : memref<2x12x16xf32, #tpu.memory_space<vmem>>, vector<1x12x16xf32>
    %1 = vector.shape_cast %0 : vector<1x12x16xf32> to vector<12x16xf32>
    %c0_2 = arith.constant 0 : index
    %c0_3 = arith.constant 0 : index
    %c0_4 = arith.constant 0 : index
    %2 = vector.load %arg2[%c0_2, %c0_3, %c0_4] : memref<2x16x128xf32, #tpu.memory_space<vmem>>, vector<1x16x128xf32>
    %3 = vector.shape_cast %2 : vector<1x16x128xf32> to vector<16x128xf32>
    %cst = arith.constant dense<0.000000e+00> : vector<12x128xf32>
    %4 = tpu.matmul %1, %3, %cst {dimension_numbers = #tpu.dot_dimension_numbers<[1], [0], [0], [1], [0, 0, 1, 1], [], []>} : vector<12x16xf32>, vector<16x128xf32>, vector<12x128xf32> -> vector<12x128xf32>
    %c0_5 = arith.constant 0 : index
    %c0_6 = arith.constant 0 : index
    %c0_7 = arith.constant 0 : index
    %5 = vector.load %arg3[%c0_5, %c0_6, %c0_7] : memref<12x2x128xf32, #tpu.memory_space<vmem>>, vector<12x1x128xf32>
    %6 = vector.shape_cast %5 : vector<12x1x128xf32> to vector<12x128xf32>
    %7 = vector.shape_cast %4 : vector<12x128xf32> to vector<12x1x128xf32>
    tpu.vector_store %arg3[%c0_5, %c0_6, %c0_7], %7 {strides = array<i32>} : memref<12x2x128xf32, #tpu.memory_space<vmem>>, vector<12x1x128xf32>,
    %c1 = arith.constant 1 : index
    %c0_8 = arith.constant 0 : index
    %c0_9 = arith.constant 0 : index
    %8 = vector.load %arg1[%c1, %c0_8, %c0_9] : memref<2x12x16xf32, #tpu.memory_space<vmem>>, vector<1x12x16xf32>
    %9 = vector.shape_cast %8 : vector<1x12x16xf32> to vector<12x16xf32>
    %c1_10 = arith.constant 1 : index
    %c0_11 = arith.constant 0 : index
    %c0_12 = arith.constant 0 : index
    %10 = vector.load %arg2[%c1_10, %c0_11, %c0_12] : memref<2x16x128xf32, #tpu.memory_space<vmem>>, vector<1x16x128xf32>
    %11 = vector.shape_cast %10 : vector<1x16x128xf32> to vector<16x128xf32>
    %cst_13 = arith.constant dense<0.000000e+00> : vector<12x128xf32>
    %12 = tpu.matmul %9, %11, %cst_13 {dimension_numbers = #tpu.dot_dimension_numbers<[1], [0], [0], [1], [0, 0, 1, 1], [], []>} : vector<12x16xf32>, vector<16x128xf32>, vector<12x128xf32> -> vector<12x128xf32>
    %c0_14 = arith.constant 0 : index
    %c1_15 = arith.constant 1 : index
    %c0_16 = arith.constant 0 : index
    %13 = vector.load %arg3[%c0_14, %c1_15, %c0_16] : memref<12x2x128xf32, #tpu.memory_space<vmem>>, vector<12x1x128xf32>
    %14 = vector.shape_cast %13 : vector<12x1x128xf32> to vector<12x128xf32>
    %15 = vector.shape_cast %12 : vector<12x128xf32> to vector<12x1x128xf32>
    tpu.vector_store %arg3[%c0_14, %c1_15, %c0_16], %15 {strides = array<i32>} : memref<12x2x128xf32, #tpu.memory_space<vmem>>, vector<12x1x128xf32>,
    return
  }
  func.func @transform_0(%arg0: i32) -> (i32, i32, i32) {
    %c0_i32 = arith.constant 0 : i32
    %c0_i32_0 = arith.constant 0 : i32
    %c0_i32_1 = arith.constant 0 : i32
    return %c0_i32, %arg0, %c0_i32_0 : i32, i32, i32
  }
  func.func @transform_1(%arg0: i32) -> (i32, i32, i32) {
    %c0_i32 = arith.constant 0 : i32
    %c0_i32_0 = arith.constant 0 : i32
    %c0_i32_1 = arith.constant 0 : i32
    %c0_i32_2 = arith.constant 0 : i32
    return %c0_i32, %c0_i32_0, %c0_i32_1 : i32, i32, i32
  }
  func.func @transform_2(%arg0: i32) -> (i32, i32, i32) {
    %c0_i32 = arith.constant 0 : i32
    %c0_i32_0 = arith.constant 0 : i32
    %c0_i32_1 = arith.constant 0 : i32
    return %arg0, %c0_i32, %c0_i32_0 : i32, i32, i32
  }
}

</mosaic_0001>

<bundles_post_ra>
// kernel: tpu_custom_call.1
= control target key start
LH: loop header
LB: loop body
LE: loop exit
PB: predicated region body
PF: predicated region fallthrough
CT: control target
= control target key end

     0   :  { %vm16_vm0 = vcmask 130048   ;;  %s536_s0 = inlined_call_operand.vmem [shape: f32[2,12,16], index: 0, kind: input, shape index: {}]   ;;  %s537_s1 = inlined_call_operand.vmem [shape: f32[2,16,128], index: 1, kind: input, shape index: {}]   ;;  %s538_s2 = inlined_call_operand.hbm [shape: f32[12,2,128], index: 2, kind: output, shape index: {}]  }
   0x1   :  { %v14_v0 = vld [vmem:[%s537_s1] sm:$0xff]  ;;  %v15_v1 = vld [vmem:[%s537_s1 + $0x8] sm:$0xff]  ;;  %v409_v2 = vld [vmem:[%s537_s1 + $0x10] sm:$0xff] }
   0x2   :  { %v441_v3 = vpack.c.bf16 %v15_v1, %v14_v0  ;;  %v410_v4 = vld [vmem:[%s537_s1 + $0x18] sm:$0xff]  ;;  %v12_v5 = vld [vmem:[%s536_s0] sm:$0xff]  ;;  %v407_v6 = vld [vmem:[%s536_s0 + $0x10] sm:$0xff] }
   0x3   :  { %v445_v7 = vpack.c.bf16 %v410_v4, %v409_v2  ;;  %431 = vmatprep.mubr.msk.f32.mxu0 %vm16_vm0, %v12_v5  ;;  %438 = vmatprep.mubr.msk.f32.mxu1 %vm16_vm0, %v407_v6 }
   0x4   :  { %7 = vsyncpa [#allocation3], 0  ;;  %442 = vmatprep.subr.bf16.mxu0 %v441_v3  ;;  %v13_v8 = vld [vmem:[%s536_s0 + $0x8] sm:$0xf]  ;;  %v408_v9 = vld [vmem:[%s536_s0 + $0x18] sm:$0xf]  ;;  %v104_v12 = vlaneseq }
   0x5   :  { %446 = vmatprep.subr.bf16.mxu1 %v445_v7  ;;  %444 = vmatpush3.bf16.msra.mxu0 %v441_v3  ;;  %v477_v10 = vmov 1966171168   ;;  %s478_s0 = smov [#allocation2]  }
   0x6   :  { %448 = vmatpush3.bf16.msra.mxu1 %v445_v7  ;;  %v102_v11 = vunpack.c.l.s4 %v477_v10  ;;  %v105_v14 = vshrl.u32 %v104_v12, 7  ;;  %s388_s24 = sshll.u32 %s478_s0, 4  ;;  %s389_s24 = int_to_ptr.vmem [resolvable:$true] %s388_s24 }
   0x7   :  { %s453_s25 = scalar_lea.vmem %s389_s24, 384  ;;  %p458_p1 = scmp.lt.s32.totalorder %s389_s24, %s389_s24 }
   0x8   :  { %432 = vmatmul.mubr.msk.f32.vlgmr.msra.gmra.mrb[0].mxu0 %vm16_vm0, %v13_v8  ;;  %v103_v13 = vunpack.c.0.s8 %v102_v11  ;;  %p454_p0 = scmp.ne.s32.totalorder %s389_s24, %s453_s25  ;;  %p459_p2 = scmp.lt.s32.totalorder %s453_s25, %s453_s25 }
   0x9   :  { %439 = vmatmul.mubr.msk.f32.vlgmr.msra.gmra.mrb[0].mxu1 %vm16_vm0, %v408_v9 }
   0xa   :  { %v106_v15 = vsub.s32 %v103_v13, %v105_v14  ;;  %p460_p3 = por %p459_p2, %p458_p1 }
   0xc   :  { %p461_p4 = pnand %p460_p3, %p454_p0 }
  0xdb   :  { %v433_v16 = vpop.f32.mrb[0].mxu0 }
  0xdc   :  { %v155_v17 = vrot.slane %v433_v16, %v106_v15  ;;  %v440_v18 = vpop.f32.mrb[0].mxu1  ;;  %v89_v19 = vpop.f32.mrb[1].mxu0 }
  0xdd   :  { %v341_v20 = vrot.slane %v440_v18, %v106_v15  ;;  %v100_v21 = vcombine.high %v89_v19, %v89_v19  ;;  %v107_v22 = vrot.slane %v89_v19, %v106_v15  ;;  %v275_v23 = vpop.f32.mrb[1].mxu1 }
  0xde   :  { %v156_v24 = vcombine.high %v155_v17, %v155_v17  ;;  %v163_v25 = vrot.slane %v155_v17, %v106_v15  ;;  %405 = vst.sshfl [vmem:[#allocation2 + $0x10] sm:$0x1 pattern:$0x73625140] %v155_v17  ;;  %v286_v26 = vcombine.high %v275_v23, %v275_v23  ;;  %v293_v27 = vrot.slane %v275_v23, %v106_v15 }
  0xdf   :  { %v342_v28 = vcombine.high %v341_v20, %v341_v20  ;;  %v349_v29 = vrot.slane %v341_v20, %v106_v15  ;;  %417 = vst.sshfl [vmem:[#allocation2 + $0x11] sm:$0x1 pattern:$0x73625140] %v341_v20  ;;  %v114_v30 = vrot.slane %v100_v21, %v106_v15  ;;  %v115_v31 = vcombine.high %v107_v22, %v107_v22 }
  0xe0   :  { %401 = vst.sshfl [vmem:[#allocation2] sm:$0x1 pattern:$0x73625140] %v107_v22  ;;  %v170_v32 = vrot.slane %v156_v24, %v106_v15  ;;  %v171_v33 = vcombine.high %v163_v25, %v163_v25  ;;  %v123_v34 = vrot.slane %v107_v22, %v106_v15  ;;  %v300_v35 = vrot.slane %v286_v26, %v106_v15 }
  0xe1   :  { %406 = vst.sshfl [vmem:[#allocation2 + $0x12] sm:$0x1 pattern:$0x73625140] %v156_v24  ;;  %v356_v36 = vrot.slane %v342_v28, %v106_v15  ;;  %v357_v37 = vcombine.high %v349_v29, %v349_v29  ;;  %v116_v38 = vcombine.high %v114_v30, %v114_v30  ;;  %v130_v39 = vrot.slane %v114_v30, %v106_v15 }
  0xe2   :  { %413 = vst.sshfl [vmem:[#allocation2 + $0x1] sm:$0x1 pattern:$0x73625140] %v293_v27  ;;  %v172_v40 = vcombine.high %v170_v32, %v170_v32  ;;  %195 = vst [vmem:[#allocation2 + $0x14] sm:$0x1] %v171_v33  ;;  %v137_v41 = vrot.slane %v115_v31, %v106_v15  ;;  %v145_v42 = vcombine.high %v123_v34, %v123_v34 }
  0xe3   :  { %418 = vst.sshfl [vmem:[#allocation2 + $0x13] sm:$0x1 pattern:$0x73625140] %v342_v28  ;;  %v301_v43 = vcombine.high %v293_v27, %v293_v27  ;;  %v358_v44 = vcombine.high %v356_v36, %v356_v36  ;;  %381 = vst [vmem:[#allocation2 + $0x15] sm:$0x1] %v357_v37  ;;  %v144_v45 = vrot.slane %v116_v38, %v106_v15 }
  0xe4   :  { %402 = vst.sshfl [vmem:[#allocation2 + $0x2] sm:$0x1 pattern:$0x73625140] %v115_v31  ;;  %v146_v46 = vcombine.high %v130_v39, %v130_v39  ;;  %v302_v47 = vcombine.high %v300_v35, %v300_v35  ;;  %196 = vst [vmem:[#allocation2 + $0x16] sm:$0x1] %v172_v40  ;;  %v147_v48 = vcombine.high %v137_v41, %v137_v41 }
  0xe5   :  { %403 = vst.sshfl [vmem:[#allocation2 + $0x8] sm:$0x1 pattern:$0x73625140] %v114_v30  ;;  %187 = vst [vmem:[#allocation2 + $0x4] sm:$0x1] %v145_v42  ;;  %v309_v49 = vrot.slane %v293_v27, %v106_v15  ;;  %v316_v50 = vrot.slane %v300_v35, %v106_v15  ;;  %v323_v51 = vrot.slane %v301_v43, %v106_v15 }
  0xe6   :  { %415 = vst.sshfl [vmem:[#allocation2 + $0x9] sm:$0x1 pattern:$0x73625140] %v300_v35  ;;  %382 = vst [vmem:[#allocation2 + $0x17] sm:$0x1] %v358_v44  ;;  %v148_v52 = vcombine.high %v144_v45, %v144_v45  ;;  %v330_v53 = vrot.slane %v302_v47, %v106_v15 }
  0xe7   :  { %404 = vst.sshfl [vmem:[#allocation2 + $0xa] sm:$0x1 pattern:$0x73625140] %v116_v38  ;;  %191 = vst [vmem:[#allocation2 + $0xc] sm:$0x1] %v146_v46  ;;  %v331_v54 = vcombine.high %v309_v49, %v309_v49  ;;  %v332_v55 = vcombine.high %v316_v50, %v316_v50  ;;  %v333_v56 = vcombine.high %v323_v51, %v323_v51 }
  0xe8   :  { %414 = vst.sshfl [vmem:[#allocation2 + $0x3] sm:$0x1 pattern:$0x73625140] %v301_v43  ;;  %188 = vst [vmem:[#allocation2 + $0x6] sm:$0x1] %v147_v48  ;;  %v334_v57 = vcombine.high %v330_v53, %v330_v53 }
  0xe9   :  { %416 = vst.sshfl [vmem:[#allocation2 + $0xb] sm:$0x1 pattern:$0x73625140] %v302_v47  ;;  %192 = vst [vmem:[#allocation2 + $0xe] sm:$0x1] %v148_v52 }
  0xea   :  { %373 = vst [vmem:[#allocation2 + $0x5] sm:$0x1] %v331_v54  ;;  %374 = vst [vmem:[#allocation2 + $0x7] sm:$0x1] %v333_v56 }
  0xeb   :  { %377 = vst [vmem:[#allocation2 + $0xd] sm:$0x1] %v332_v55  ;;  %378 = vst [vmem:[#allocation2 + $0xf] sm:$0x1] %v334_v57 }
  0xec   :  { %464 = shalt.err (!%p461_p4)
}
  0xed   :  { %s465_s28 = scalar_lea.hbm %s538_s2, 384 }
  0xee   :  { %p466_p5 = scmp.ne.s32.totalorder %s538_s2, %s465_s28  ;;  %p469_p6 = scmp.lt.u32.totalorder %s465_s28, %s538_s2 }
  0xf0   :  { %p471_p7 = pnand %p469_p6, %p466_p5 }
  0xf2   :  { %474 = shalt.err (!%p471_p7)
}
  0xf3   :  { %s479_s5 = smov 32   ;;  %s480_s6 = smov 2  }
  0xf4   :  { %394 = dma.vmem_to_hbm [thread:$0]  %s389_s24, 384, %s538_s2, [#allocation3], %s479_s5, %s479_s5, %s480_s6  }
  0xf5   :  { %475 = dma.done.wait [#allocation3], 384  }
  0xf6   :  { %476 = vsyncadd [#allocation3], 4294966912 }
  0xf7   :  { %398 = vsyncpa [#allocation3], 1 }

</bundles_post_ra>
